<compile_context>
chip_gen: v5e
topology: v5e:2x2
jax: 0.10.0
libtpu: 0.0.40
codegen_flags: <defaults>
</compile_context>

<pallas_src>
import functools

import jax
import jax.numpy as jnp
from jax import lax
from jax.experimental import pallas as pl
from jax.experimental.pallas import tpu as pltpu

NUM_REWARD_FEATS = 8           # module-level constant in the original file
REWARD_EMBED_SIZE = 16
DROPOUT_P = 0.4


def _round_up(x, m):
    return ((x + m - 1) // m) * m


def _hash_u32(x):
    # lowbias32-style integer hash; pure VPU integer ops (works on TPU + interpret).
    x = x ^ (x >> jnp.uint32(16))
    x = x * jnp.uint32(0x7FEB352D)
    x = x ^ (x >> jnp.uint32(15))
    x = x * jnp.uint32(0x846CA68B)
    x = x ^ (x >> jnp.uint32(16))
    return x


def _linear_relu_t(x_ref, w_ref, b_ref):
    """y[e, n] = relu(sum_f w[e, f] * x[f, n] + b[e]) in transposed (batch-on-lanes) layout."""
    E, F = w_ref.shape                 # (16, 8)
    block_b = x_ref.shape[1]           # lanes (multiple of 128)
    x_t = x_ref[...].astype(jnp.float32)   # (F, block_b)
    w_t = w_ref[...].astype(jnp.float32)   # (E, F)
    acc = jnp.broadcast_to(b_ref[...].astype(jnp.float32), (E, block_b))
    # K = F = 8: unrolled broadcast-FMAs on the VPU; skips MXU K/N padding.
    for f in range(F):
        acc = acc + w_t[:, f:f + 1] * x_t[f:f + 1, :]
    return jnp.maximum(acc, 0.0)


def _reward_encoder_eval_kernel(x_ref, w_ref, b_ref, o_ref):
    o_ref[...] = _linear_relu_t(x_ref, w_ref, b_ref).astype(o_ref.dtype)


def _reward_encoder_train_kernel(seed_ref, x_ref, w_ref, b_ref, o_ref, *, dropout_p):
    y = _linear_relu_t(x_ref, w_ref, b_ref)
    E, block_b = y.shape
    if dropout_p >= 1.0:               # compile-time special case (threshold would overflow u32)
        o_ref[...] = jnp.zeros_like(y).astype(o_ref.dtype)
        return
    # Stateless counter-hash dropout mask; block id folded into the seed so every
    # batch tile gets an independent mask.
    seed_u = seed_ref[0].astype(jnp.uint32)
    blk = pl.program_id(0).astype(jnp.uint32)
    rows = lax.broadcasted_iota(jnp.int32, (E, block_b), 0).astype(jnp.uint32)
    cols = lax.broadcasted_iota(jnp.int32, (E, block_b), 1).astype(jnp.uint32)
    ctr = (blk * jnp.uint32(block_b) + cols) * jnp.uint32(E) + rows
    bits = _hash_u32(ctr ^ (seed_u * jnp.uint32(2654435761)))
    threshold = jnp.uint32(min(int(round(dropout_p * 4294967296.0)), 4294967295))
    keep = bits >= threshold                              # P(keep) = 1 - dropout_p
    scale = jnp.float32(1.0 / (1.0 - dropout_p))
    o_ref[...] = jnp.where(keep, y * scale, jnp.float32(0.0)).astype(o_ref.dtype)


def reward_encoder(x, w, b, *, training=False, dropout_p=DROPOUT_P, seed=0,
                   block_b=4096):
    """x: [B, F] f32, w: [F, E] f32, b: [E] f32 -> dropout(relu(x @ w + b))."""
    B, F = x.shape
    Fw, E = w.shape
    assert Fw == F and b.shape == (E,)

    # Batch tile: multiple of 128 (lane width); large to amortize ~0.35us/step
    # grid overhead, tiny vs. the 32 MiB scoped-VMEM budget at F=8/E=16.
    block_b = max(128, min(int(block_b), _round_up(B, 128)))
    Bp = _round_up(B, block_b)

    # Transposed, lane-dense operands (batch on lanes).
    x_t = jnp.pad(x, ((0, Bp - B), (0, 0))).T          # (F, Bp)
    w_t = w.T                                          # (E, F)
    b_col = b.reshape(E, 1)                            # (E, 1)

    grid = (Bp // block_b,)
    x_spec = pl.BlockSpec((F, block_b), lambda i: (0, i))
    w_spec = pl.BlockSpec((E, F), lambda i: (0, 0))
    b_spec = pl.BlockSpec((E, 1), lambda i: (0, 0))
    o_spec = pl.BlockSpec((E, block_b), lambda i: (0, i))

    cost = pl.CostEstimate(
        flops=2 * B * F * E,
        transcendentals=0,
        bytes_accessed=4 * (B * F + F * E + E + B * E),
    )
    cparams = pltpu.CompilerParams(dimension_semantics=("parallel",))
    out_shape = jax.ShapeDtypeStruct((E, Bp), x.dtype)

    if training and dropout_p > 0.0:
        seed_arr = jnp.asarray([seed], dtype=jnp.int32)
        kernel = functools.partial(_reward_encoder_train_kernel,
                                   dropout_p=float(dropout_p))
        out_t = pl.pallas_call(
            kernel,
            out_shape=out_shape,
            grid=grid,
            in_specs=[pl.BlockSpec(memory_space=pltpu.SMEM),   # seed scalar
                      x_spec, w_spec, b_spec],
            out_specs=o_spec,
            compiler_params=cparams,
            cost_estimate=cost,
        )(seed_arr, x_t, w_t, b_col)
    else:
        out_t = pl.pallas_call(
            _reward_encoder_eval_kernel,
            out_shape=out_shape,
            grid=grid,
            in_specs=[x_spec, w_spec, b_spec],
            out_specs=o_spec,
            compiler_params=cparams,
            cost_estimate=cost,
        )(x_t, w_t, b_col)

    return out_t.T[:B]


if __name__ == "__main__":
    key = jax.random.PRNGKey(0)
    k_x, k_w, k_b, k_x2 = jax.random.split(key, 4)

    batch = 4
    x = jax.random.normal(k_x, (batch, NUM_REWARD_FEATS), dtype=jnp.float32)

    # Deterministic synthetic parameters (shapes per nn.Linear(NUM_REWARD_FEATS, 16)).
    bound = 1.0 / (NUM_REWARD_FEATS ** 0.5)
    w = jax.random.uniform(k_w, (NUM_REWARD_FEATS, REWARD_EMBED_SIZE),
                           jnp.float32, -bound, bound)
    b = jax.random.uniform(k_b, (REWARD_EMBED_SIZE,), jnp.float32, -bound, bound)

    # Eval mode (dropout == identity): compare against pure-JAX reference.
    out = jax.block_until_ready(reward_encoder(x, w, b, training=False))
    ref = jnp.maximum(x @ w + b, 0.0)
    assert out.shape == (batch, REWARD_EMBED_SIZE)
    assert jnp.allclose(out, ref, atol=1e-5, rtol=1e-5), "eval mismatch"

    # Multi-block grid path (exercises tiling / index maps, non-multiple batch).
    batch2 = 260
    x2 = jax.random.normal(k_x2, (batch2, NUM_REWARD_FEATS), dtype=jnp.float32)
    out2 = jax.block_until_ready(
        reward_encoder(x2, w, b, training=False, block_b=128))
    ref2 = jnp.maximum(x2 @ w + b, 0.0)
    assert out2.shape == (batch2, REWARD_EMBED_SIZE)
    assert jnp.allclose(out2, ref2, atol=1e-5, rtol=1e-5), "gridded eval mismatch"

    # Training mode: surviving elements equal ref / (1 - p); dropped are exactly 0.
    out_tr = jax.block_until_ready(reward_encoder(x, w, b, training=True, seed=123))
    assert out_tr.shape == (batch, REWARD_EMBED_SIZE)
    kept = out_tr != 0
    assert jnp.allclose(jnp.where(kept, out_tr, 0.0),
                        jnp.where(kept, ref / (1.0 - DROPOUT_P), 0.0),
                        atol=1e-4, rtol=1e-4), "train mismatch"

    print("KERNEL_OK")
</pallas_src>

<mosaic_0001>
module attributes {stable_mosaic.version = 11 : i64} {
  func.func @_reward_encoder_eval_kernel(%arg0: i32, %arg1: memref<8x128xf32, #tpu.memory_space<vmem>>, %arg2: memref<16x8xf32, #tpu.memory_space<vmem>>, %arg3: memref<16x1xf32, #tpu.memory_space<vmem>>, %arg4: memref<16x128xf32, #tpu.memory_space<vmem>>) attributes {dimension_semantics = [#tpu.dimension_semantics<parallel>], iteration_bounds = array<i64: 1>, scalar_prefetch = 0 : i64, scratch_operands = 0 : i64, tpu.core_type = #tpu.core_type<tc>, window_params = [{transform_indices = @transform_0, window_bounds = array<i64: 8, 128>}, {pipeline_mode = #tpu.pipeline_mode<synchronous>, transform_indices = @transform_1, window_bounds = array<i64: 16, 8>}, {pipeline_mode = #tpu.pipeline_mode<synchronous>, transform_indices = @transform_2, window_bounds = array<i64: 16, 1>}, {transform_indices = @transform_3, window_bounds = array<i64: 16, 128>}]} {
    %c0 = arith.constant 0 : index
    %c0_0 = arith.constant 0 : index
    %0 = vector.load %arg1[%c0, %c0_0] : memref<8x128xf32, #tpu.memory_space<vmem>>, vector<8x128xf32>
    %c0_1 = arith.constant 0 : index
    %c0_2 = arith.constant 0 : index
    %1 = vector.load %arg2[%c0_1, %c0_2] : memref<16x8xf32, #tpu.memory_space<vmem>>, vector<16x8xf32>
    %c0_3 = arith.constant 0 : index
    %c0_4 = arith.constant 0 : index
    %2 = vector.load %arg3[%c0_3, %c0_4] : memref<16x1xf32, #tpu.memory_space<vmem>>, vector<16x1xf32>
    %3 = vector.shape_cast %2 : vector<16x1xf32> to vector<16x1xf32>
    %4 = vector.broadcast %3 : vector<16x1xf32> to vector<16x128xf32>
    %5 = vector.extract_strided_slice %1 {offsets = [0, 0], sizes = [16, 1], strides = [1, 1]} : vector<16x8xf32> to vector<16x1xf32>
    %6 = vector.extract_strided_slice %0 {offsets = [0, 0], sizes = [1, 128], strides = [1, 1]} : vector<8x128xf32> to vector<1x128xf32>
    %7 = vector.broadcast %5 : vector<16x1xf32> to vector<16x128xf32>
    %8 = vector.broadcast %6 : vector<1x128xf32> to vector<16x128xf32>
    %9 = arith.mulf %7, %8 : vector<16x128xf32>
    %10 = arith.addf %4, %9 : vector<16x128xf32>
    %11 = vector.extract_strided_slice %1 {offsets = [0, 1], sizes = [16, 1], strides = [1, 1]} : vector<16x8xf32> to vector<16x1xf32>
    %12 = vector.extract_strided_slice %0 {offsets = [1, 0], sizes = [1, 128], strides = [1, 1]} : vector<8x128xf32> to vector<1x128xf32>
    %13 = vector.broadcast %11 : vector<16x1xf32> to vector<16x128xf32>
    %14 = vector.broadcast %12 : vector<1x128xf32> to vector<16x128xf32>
    %15 = arith.mulf %13, %14 : vector<16x128xf32>
    %16 = arith.addf %10, %15 : vector<16x128xf32>
    %17 = vector.extract_strided_slice %1 {offsets = [0, 2], sizes = [16, 1], strides = [1, 1]} : vector<16x8xf32> to vector<16x1xf32>
    %18 = vector.extract_strided_slice %0 {offsets = [2, 0], sizes = [1, 128], strides = [1, 1]} : vector<8x128xf32> to vector<1x128xf32>
    %19 = vector.broadcast %17 : vector<16x1xf32> to vector<16x128xf32>
    %20 = vector.broadcast %18 : vector<1x128xf32> to vector<16x128xf32>
    %21 = arith.mulf %19, %20 : vector<16x128xf32>
    %22 = arith.addf %16, %21 : vector<16x128xf32>
    %23 = vector.extract_strided_slice %1 {offsets = [0, 3], sizes = [16, 1], strides = [1, 1]} : vector<16x8xf32> to vector<16x1xf32>
    %24 = vector.extract_strided_slice %0 {offsets = [3, 0], sizes = [1, 128], strides = [1, 1]} : vector<8x128xf32> to vector<1x128xf32>
    %25 = vector.broadcast %23 : vector<16x1xf32> to vector<16x128xf32>
    %26 = vector.broadcast %24 : vector<1x128xf32> to vector<16x128xf32>
    %27 = arith.mulf %25, %26 : vector<16x128xf32>
    %28 = arith.addf %22, %27 : vector<16x128xf32>
    %29 = vector.extract_strided_slice %1 {offsets = [0, 4], sizes = [16, 1], strides = [1, 1]} : vector<16x8xf32> to vector<16x1xf32>
    %30 = vector.extract_strided_slice %0 {offsets = [4, 0], sizes = [1, 128], strides = [1, 1]} : vector<8x128xf32> to vector<1x128xf32>
    %31 = vector.broadcast %29 : vector<16x1xf32> to vector<16x128xf32>
    %32 = vector.broadcast %30 : vector<1x128xf32> to vector<16x128xf32>
    %33 = arith.mulf %31, %32 : vector<16x128xf32>
    %34 = arith.addf %28, %33 : vector<16x128xf32>
    %35 = vector.extract_strided_slice %1 {offsets = [0, 5], sizes = [16, 1], strides = [1, 1]} : vector<16x8xf32> to vector<16x1xf32>
    %36 = vector.extract_strided_slice %0 {offsets = [5, 0], sizes = [1, 128], strides = [1, 1]} : vector<8x128xf32> to vector<1x128xf32>
    %37 = vector.broadcast %35 : vector<16x1xf32> to vector<16x128xf32>
    %38 = vector.broadcast %36 : vector<1x128xf32> to vector<16x128xf32>
    %39 = arith.mulf %37, %38 : vector<16x128xf32>
    %40 = arith.addf %34, %39 : vector<16x128xf32>
    %41 = vector.extract_strided_slice %1 {offsets = [0, 6], sizes = [16, 1], strides = [1, 1]} : vector<16x8xf32> to vector<16x1xf32>
    %42 = vector.extract_strided_slice %0 {offsets = [6, 0], sizes = [1, 128], strides = [1, 1]} : vector<8x128xf32> to vector<1x128xf32>
    %43 = vector.broadcast %41 : vector<16x1xf32> to vector<16x128xf32>
    %44 = vector.broadcast %42 : vector<1x128xf32> to vector<16x128xf32>
    %45 = arith.mulf %43, %44 : vector<16x128xf32>
    %46 = arith.addf %40, %45 : vector<16x128xf32>
    %47 = vector.extract_strided_slice %1 {offsets = [0, 7], sizes = [16, 1], strides = [1, 1]} : vector<16x8xf32> to vector<16x1xf32>
    %48 = vector.extract_strided_slice %0 {offsets = [7, 0], sizes = [1, 128], strides = [1, 1]} : vector<8x128xf32> to vector<1x128xf32>
    %49 = vector.broadcast %47 : vector<16x1xf32> to vector<16x128xf32>
    %50 = vector.broadcast %48 : vector<1x128xf32> to vector<16x128xf32>
    %51 = arith.mulf %49, %50 : vector<16x128xf32>
    %52 = arith.addf %46, %51 : vector<16x128xf32>
    %cst = arith.constant 0.000000e+00 : f32
    %53 = vector.broadcast %cst : f32 to vector<16x128xf32>
    %54 = arith.maximumf %52, %53 : vector<16x128xf32>
    %c0_5 = arith.constant 0 : index
    %c0_6 = arith.constant 0 : index
    %55 = vector.load %arg4[%c0_5, %c0_6] : memref<16x128xf32, #tpu.memory_space<vmem>>, vector<16x128xf32>
    tpu.vector_store %arg4[%c0_5, %c0_6], %54 {strides = array<i32>} : memref<16x128xf32, #tpu.memory_space<vmem>>, vector<16x128xf32>,
    return
  }
  func.func @transform_0(%arg0: i32) -> (i32, i32) {
    %c0_i32 = arith.constant 0 : i32
    %c0_i32_0 = arith.constant 0 : i32
    return %c0_i32, %arg0 : i32, i32
  }
  func.func @transform_1(%arg0: i32) -> (i32, i32) {
    %c0_i32 = arith.constant 0 : i32
    %c0_i32_0 = arith.constant 0 : i32
    %c0_i32_1 = arith.constant 0 : i32
    return %c0_i32, %c0_i32_0 : i32, i32
  }
  func.func @transform_2(%arg0: i32) -> (i32, i32) {
    %c0_i32 = arith.constant 0 : i32
    %c0_i32_0 = arith.constant 0 : i32
    %c0_i32_1 = arith.constant 0 : i32
    return %c0_i32, %c0_i32_0 : i32, i32
  }
  func.func @transform_3(%arg0: i32) -> (i32, i32) {
    %c0_i32 = arith.constant 0 : i32
    %c0_i32_0 = arith.constant 0 : i32
    return %c0_i32, %arg0 : i32, i32
  }
}

</mosaic_0001>

<bundles_post_ra>
// kernel: tpu_custom_call.1
= control target key start
LH: loop header
LB: loop body
LE: loop exit
PB: predicated region body
PF: predicated region fallthrough
CT: control target
= control target key end

     0   :  { %v210_v2 = vmov 0   ;;  %s259_s0 = inlined_call_operand.vmem [shape: f32[8,128], index: 0, kind: input, shape index: {}]   ;;  %s260_s1 = inlined_call_operand.vmem [shape: f32[16,8], index: 1, kind: input, shape index: {}]   ;;  %s261_s2 = inlined_call_operand.vmem [shape: f32[16,1], index: 2, kind: input, shape index: {}]   ;;  %s262_s3 = inlined_call_operand.hbm [shape: f32[16,128], index: 3, kind: output, shape index: {}]  }
   0x1   :  { %v18_v0 = vld [vmem:[%s261_s2] sm:$0xff]  ;;  %170 = vset.pattern.permute.xlu1 %v210_v2  ;;  %169 = vset.pattern.permute.xlu0 %v210_v2 }
   0x2   :  { %v16_v1 = vld [vmem:[%s260_s1] sm:$0xff] }
   0x3   :  { %8 = vsyncpa [#allocation3], 0  ;;  %22 = vperm.xlu0 %169, %v18_v0   ;;  %32 = vperm.xlu1 %170, %v16_v1   ;;  %v211_v3 = vmov 1   ;;  %v19_v4 = vld [vmem:[%s261_s2 + $0x8] sm:$0xff]  ;;  %v212_v6 = vmov 2   ;;  %v213_v7 = vmov 3  }
   0x4   :  { %171 = vset.pattern.permute.xlu2 %v211_v3  ;;  %v17_v5 = vld [vmem:[%s260_s1 + $0x8] sm:$0xff]  ;;  %v214_v8 = vmov 4   ;;  %v215_v9 = vmov 5   ;;  %v216_v10 = vmov 7   ;;  %v217_v11 = vmov 6   ;;  %v15_v20 = vld [vmem:[%s259_s0] sm:$0xff] }
   0x5   :  { %46 = vperm.xlu2 %171, %v16_v1   ;;  %v40_v21 = vperm.slane %v15_v20, 0  ;;  %v53_v22 = vperm.slane %v15_v20, 1  ;;  %v66_v27 = vperm.slane %v15_v20, 2  ;;  %v79_v31 = vperm.slane %v15_v20, 3  ;;  %s218_s0 = smov [#allocation2]   ;;  %s146_s23 = sshll.u32 %s262_s3, 4  ;;  %s147_s23 = int_to_ptr.hbm [resolvable:$true] %s146_s23 }
   0x6   :  { %v92_v37 = vperm.slane %v15_v20, 4  ;;  %v105_v47 = vperm.slane %v15_v20, 5  ;;  %v131_v50 = vperm.slane %v15_v20, 7  ;;  %v118_v54 = vperm.slane %v15_v20, 6  ;;  %s144_s20 = sshll.u32 %s218_s0, 4  ;;  %s219_s24 = smov 128   ;;  %s145_s20 = int_to_ptr.vmem [resolvable:$true] %s144_s20 }
   0x7   :  { %s220_s25 = smov 8  }
   0xb   :  { %27 = vperm.xlu0 %169, %v19_v4   ;;  %37 = vperm.xlu1 %170, %v17_v5  }
   0xd   :  { %50 = vperm.xlu2 %171, %v17_v5  }
  0x13   :  { %172 = vset.pattern.permute.xlu0 %v212_v6  ;;  %173 = vset.pattern.permute.xlu1 %v212_v6 }
  0x14   :  { %59 = vperm.xlu0 %172, %v16_v1   ;;  %63 = vperm.xlu1 %173, %v17_v5  }
  0x15   :  { %174 = vset.pattern.permute.xlu2 %v213_v7 }
  0x16   :  { %72 = vperm.xlu2 %174, %v16_v1  }
  0x1c   :  { %175 = vset.pattern.permute.xlu1 %v213_v7  ;;  %177 = vset.pattern.permute.xlu0 %v214_v8 }
  0x1d   :  { %76 = vperm.xlu1 %175, %v17_v5   ;;  %89 = vperm.xlu0 %177, %v17_v5  }
  0x1e   :  { %176 = vset.pattern.permute.xlu2 %v214_v8 }
  0x1f   :  { %85 = vperm.xlu2 %176, %v16_v1  }
  0x25   :  { %178 = vset.pattern.permute.xlu1 %v215_v9  ;;  %182 = vset.pattern.permute.xlu0 %v216_v10 }
  0x26   :  { %98 = vperm.xlu1 %178, %v16_v1   ;;  %124 = vperm.xlu0 %182, %v16_v1  }
  0x27   :  { %179 = vset.pattern.permute.xlu2 %v215_v9 }
  0x28   :  { %102 = vperm.xlu2 %179, %v17_v5  }
  0x2e   :  { %180 = vset.pattern.permute.xlu1 %v217_v11 }
  0x2f   :  { %111 = vperm.xlu1 %180, %v16_v1  }
  0x30   :  { %181 = vset.pattern.permute.xlu2 %v217_v11 }
  0x31   :  { %115 = vperm.xlu2 %181, %v17_v5  }
  0x37   :  { %183 = vset.pattern.permute.xlu1 %v216_v10 }
  0x38   :  { %128 = vperm.xlu1 %183, %v17_v5  }
  0x5f   :  { %v47_v12 = vpop.permute.xlu2 %46 }
  0x60   :  { %v54_v28 = vmul.f32 %v53_v22, %v47_v12 }
  0x67   :  { %v51_v15 = vpop.permute.xlu2 %50 }
  0x68   :  { %v55_v40 = vmul.f32 %v53_v22, %v51_v15 }
  0x70   :  { %v73_v18 = vpop.permute.xlu2 %72 }
  0x71   :  { %v80_v36 = vmul.f32 %v79_v31, %v73_v18 }
  0x75   :  { %v33_v13 = vpop.permute.xlu1 %32  ;;  %v23_v14 = vpop.permute.xlu0 %22 }
  0x76   :  { %v41_v23 = vmul.f32 %v40_v21, %v33_v13 }
  0x78   :  { %v43_v29 = vadd.f32 %v41_v23, %v23_v14 }
  0x79   :  { %v86_v26 = vpop.permute.xlu2 %85 }
  0x7a   :  { %v56_v33 = vadd.f32 %v54_v28, %v43_v29  ;;  %v93_v45 = vmul.f32 %v92_v37, %v86_v26 }
  0x7d   :  { %v38_v16 = vpop.permute.xlu1 %37  ;;  %v28_v17 = vpop.permute.xlu0 %27 }
  0x7e   :  { %v42_v30 = vmul.f32 %v40_v21, %v38_v16 }
  0x80   :  { %v44_v34 = vadd.f32 %v42_v30, %v28_v17 }
  0x82   :  { %v103_v42 = vpop.permute.xlu2 %102  ;;  %v57_v43 = vadd.f32 %v55_v40, %v44_v34 }
  0x83   :  { %v107_v60 = vmul.f32 %v105_v47, %v103_v42 }
  0x86   :  { %v64_v19 = vpop.permute.xlu1 %63  ;;  %v60_v24 = vpop.permute.xlu0 %59 }
  0x87   :  { %v67_v32 = vmul.f32 %v66_v27, %v60_v24  ;;  %v68_v41 = vmul.f32 %v66_v27, %v64_v19 }
  0x89   :  { %v69_v38 = vadd.f32 %v67_v32, %v56_v33  ;;  %v70_v48 = vadd.f32 %v68_v41, %v57_v43 }
  0x8b   :  { %v82_v46 = vadd.f32 %v80_v36, %v69_v38  ;;  %v116_v62 = vpop.permute.xlu2 %115 }
  0x8c   :  { %v120_v2 = vmul.f32 %v118_v54, %v116_v62 }
  0x8d   :  { %v95_v55 = vadd.f32 %v93_v45, %v82_v46 }
  0x8f   :  { %v77_v25 = vpop.permute.xlu1 %76  ;;  %v90_v35 = vpop.permute.xlu0 %89 }
  0x90   :  { %v81_v44 = vmul.f32 %v79_v31, %v77_v25  ;;  %v94_v52 = vmul.f32 %v92_v37, %v90_v35 }
  0x92   :  { %v83_v51 = vadd.f32 %v81_v44, %v70_v48 }
  0x94   :  { %v96_v61 = vadd.f32 %v94_v52, %v83_v51 }
  0x96   :  { %v109_v1 = vadd.f32 %v107_v60, %v96_v61 }
  0x98   :  { %v99_v39 = vpop.permute.xlu1 %98  ;;  %v125_v53 = vpop.permute.xlu0 %124  ;;  %v122_v5 = vadd.f32 %v120_v2, %v109_v1 }
  0x99   :  { %v106_v49 = vmul.f32 %v105_v47, %v99_v39  ;;  %v132_v59 = vmul.f32 %v131_v50, %v125_v53 }
  0x9b   :  { %v108_v57 = vadd.f32 %v106_v49, %v95_v55 }
  0xa1   :  { %v112_v56 = vpop.permute.xlu1 %111 }
  0xa2   :  { %v119_v58 = vmul.f32 %v118_v54, %v112_v56 }
  0xa4   :  { %v121_v63 = vadd.f32 %v119_v58, %v108_v57 }
  0xa6   :  { %v134_v0 = vadd.f32 %v132_v59, %v121_v63 }
  0xa8   :  { %v136_v3 = vmax.f32 %v134_v0, 0.0 }
  0xaa   :  { %138 = vst [vmem:[#allocation2] sm:$0xff] %v136_v3  ;;  %v129_v4 = vpop.permute.xlu1 %128 }
  0xab   :  { %v133_v6 = vmul.f32 %v131_v50, %v129_v4 }
  0xad   :  { %v135_v7 = vadd.f32 %v133_v6, %v122_v5 }
  0xaf   :  { %v137_v8 = vmax.f32 %v135_v7, 0.0 }
  0xb1   :  { %139 = vst [vmem:[#allocation2 + $0x8] sm:$0xff] %v137_v8 }
  0xb2   :  { %152 = dma.vmem_to_hbm [thread:$0]  %s145_s20, 256, %s147_s23, [#allocation3], %s219_s24, %s219_s24, %s220_s25  }
  0xb3   :  { %208 = dma.done.wait [#allocation3], 256  }
  0xb4   :  { %209 = vsyncadd [#allocation3], 4294967040 }
  0xb5   :  { %157 = vsyncpa [#allocation3], 1 }

</bundles_post_ra>
